<compile_context>
chip_gen: v7x
topology: tpu7x:2x2x1
jax: 0.10.0
libtpu: 0.0.40
codegen_flags: <defaults>
</compile_context>

<pallas_src>
import math

import jax
import jax.numpy as jnp
from jax.experimental import pallas as pl
from jax.experimental.pallas import tpu as pltpu

INPUT_SIZE = 10
LAYER_SIZE = 15
OUTPUT_SIZE = 5
NUM_SAMPLES = 200

PAD = 128                 # lane width: padded contraction / hidden width
PARAM_ROWS = 2 * PAD      # W1aug tile (128 rows) + W2aug tile (128 rows)


def mlp_kernel(x_ref, p_ref, o_ref, xa_ref):
    n = x_ref.shape[0]

    # Build augmented activations [x | 1 | zeros] in VMEM scratch (lane-dense
    # MXU operand).  The constant-1 column rides the matmuls to apply both
    # biases; zeroing first guarantees the padded lanes are exactly 0.
    xa_ref[...] = jnp.zeros_like(xa_ref)
    xa_ref[:, :INPUT_SIZE] = x_ref[...]
    xa_ref[:, INPUT_SIZE:INPUT_SIZE + 1] = jnp.ones((n, 1), jnp.float32)

    # Static, tile-aligned views into the packed parameter slab.
    w1 = p_ref[0:PAD, :]          # (128, 128)  [W1; b1; 1-hook], rest 0
    w2 = p_ref[PAD:2 * PAD, :]    # (128, 128)  [W2; b2], rest 0

    # Layer 1 (+bias via augmented column) on the MXU, ReLU on the VPU.
    h = jnp.maximum(
        jnp.dot(xa_ref[...], w1, preferred_element_type=jnp.float32), 0.0)
    # Layer 2 (+bias via hidden column 15 == 1 after ReLU).
    out = jnp.dot(h, w2, preferred_element_type=jnp.float32)

    o_ref[...] = out[:, :OUTPUT_SIZE].astype(o_ref.dtype)


def pack_params(w1, b1, w2, b2):
    """Pack weights + folded biases into one (256, 128) f32 slab. Call ONCE."""
    p = jnp.zeros((PARAM_ROWS, PAD), jnp.float32)
    # Augmented W1: rows 0:10 = W1, row 10 = b1, and the "1-hook" so that
    # hidden column 15 becomes a constant 1 (carries b2 through layer 2).
    p = p.at[:INPUT_SIZE, :LAYER_SIZE].set(w1)
    p = p.at[INPUT_SIZE, :LAYER_SIZE].set(b1.reshape(-1))
    p = p.at[INPUT_SIZE, LAYER_SIZE].set(1.0)
    # Augmented W2: rows 0:15 = W2, row 15 = b2.
    p = p.at[PAD:PAD + LAYER_SIZE, :OUTPUT_SIZE].set(w2)
    p = p.at[PAD + LAYER_SIZE, :OUTPUT_SIZE].set(b2.reshape(-1))
    return p


def _forward(x, params):
    n = x.shape[0]
    # FLOPs actually executed (padded MACs), not the 70 KFLOP logical count.
    flops = 2 * n * PAD * PAD * 2
    bytes_accessed = 4 * (n * INPUT_SIZE + PARAM_ROWS * PAD + n * OUTPUT_SIZE)

    return pl.pallas_call(
        mlp_kernel,
        out_shape=jax.ShapeDtypeStruct((n, OUTPUT_SIZE), jnp.float32),
        # Tiny problem: full-array blocks, no grid (block == full array dims is
        # exempt from the (8,128) rule).  At N=200 a grid / megacore split only
        # adds per-step overhead; add a batch grid only if N grows a lot.
        in_specs=[
            pl.BlockSpec((n, INPUT_SIZE), lambda: (0, 0)),
            pl.BlockSpec((PARAM_ROWS, PAD), lambda: (0, 0)),
        ],
        out_specs=pl.BlockSpec((n, OUTPUT_SIZE), lambda: (0, 0)),
        scratch_shapes=[pltpu.VMEM((n, PAD), jnp.float32)],
        cost_estimate=pl.CostEstimate(
            flops=flops, transcendentals=0, bytes_accessed=bytes_accessed),
    )(x, params)


neural_network_forward = jax.jit(_forward)


def init_params(key):
    """Deterministic init mimicking torch.nn.Linear default (+/- 1/sqrt(fan_in))."""
    k1, k2, k3, k4 = jax.random.split(key, 4)
    bound1 = 1.0 / math.sqrt(INPUT_SIZE)
    bound2 = 1.0 / math.sqrt(LAYER_SIZE)
    w1 = jax.random.uniform(k1, (INPUT_SIZE, LAYER_SIZE), jnp.float32, -bound1, bound1)
    b1 = jax.random.uniform(k2, (1, LAYER_SIZE), jnp.float32, -bound1, bound1)
    w2 = jax.random.uniform(k3, (LAYER_SIZE, OUTPUT_SIZE), jnp.float32, -bound2, bound2)
    b2 = jax.random.uniform(k4, (1, OUTPUT_SIZE), jnp.float32, -bound2, bound2)
    return w1, b1, w2, b2


if __name__ == "__main__":
    key = jax.random.PRNGKey(0)
    k_x, k_params = jax.random.split(key)

    x = jax.random.normal(k_x, (NUM_SAMPLES, INPUT_SIZE), jnp.float32)
    w1, b1, w2, b2 = init_params(k_params)

    # Pack once at init (hoisted out of the per-call path; weights are static).
    params = jax.block_until_ready(pack_params(w1, b1, w2, b2))

    out = neural_network_forward(x, params)
    out = jax.block_until_ready(out)

    # Reference check against plain JAX (PyTorch semantics; weights stored
    # pre-transposed as [in, out]).
    ref = jnp.maximum(x @ w1 + b1, 0.0) @ w2 + b2
    assert out.shape == (NUM_SAMPLES, OUTPUT_SIZE)
    assert jnp.allclose(out, ref, atol=1e-5, rtol=1e-5)

    print("KERNEL_OK")
</pallas_src>

<mosaic_0001>
module attributes {stable_mosaic.version = 11 : i64} {
  func.func @mlp_kernel(%arg0: memref<200x10xf32, #tpu.memory_space<vmem>>, %arg1: memref<256x128xf32, #tpu.memory_space<vmem>>, %arg2: memref<200x5xf32, #tpu.memory_space<vmem>>, %arg3: memref<200x128xf32, #tpu.memory_space<vmem>>) attributes {dimension_semantics = [], scalar_prefetch = 0 : i64, scratch_operands = 1 : i64, tpu.core_type = #tpu.core_type<tc>} {
    %cst = arith.constant 0.000000e+00 : f32
    %0 = vector.broadcast %cst : f32 to vector<200x128xf32>
    %c0 = arith.constant 0 : index
    %c0_0 = arith.constant 0 : index
    %1 = vector.load %arg3[%c0, %c0_0] : memref<200x128xf32, #tpu.memory_space<vmem>>, vector<200x128xf32>
    tpu.vector_store %arg3[%c0, %c0_0], %0 {strides = array<i32>} : memref<200x128xf32, #tpu.memory_space<vmem>>, vector<200x128xf32>,
    %c0_1 = arith.constant 0 : index
    %c0_2 = arith.constant 0 : index
    %2 = vector.load %arg0[%c0_1, %c0_2] : memref<200x10xf32, #tpu.memory_space<vmem>>, vector<200x10xf32>
    %c0_3 = arith.constant 0 : index
    %c0_4 = arith.constant 0 : index
    %3 = vector.load %arg3[%c0_3, %c0_4] : memref<200x128xf32, #tpu.memory_space<vmem>>, vector<200x10xf32>
    tpu.vector_store %arg3[%c0_3, %c0_4], %2 {strides = array<i32>} : memref<200x128xf32, #tpu.memory_space<vmem>>, vector<200x10xf32>,
    %cst_5 = arith.constant 1.000000e+00 : f32
    %4 = vector.broadcast %cst_5 : f32 to vector<200x1xf32>
    %c0_6 = arith.constant 0 : index
    %c10 = arith.constant 10 : index
    %5 = vector.load %arg3[%c0_6, %c10] : memref<200x128xf32, #tpu.memory_space<vmem>>, vector<200x1xf32>
    tpu.vector_store %arg3[%c0_6, %c10], %4 {strides = array<i32>} : memref<200x128xf32, #tpu.memory_space<vmem>>, vector<200x1xf32>,
    %c0_7 = arith.constant 0 : index
    %c0_8 = arith.constant 0 : index
    %6 = vector.load %arg1[%c0_7, %c0_8] : memref<256x128xf32, #tpu.memory_space<vmem>>, vector<128x128xf32>
    %c128 = arith.constant 128 : index
    %c0_9 = arith.constant 0 : index
    %7 = vector.load %arg1[%c128, %c0_9] : memref<256x128xf32, #tpu.memory_space<vmem>>, vector<128x128xf32>
    %c0_10 = arith.constant 0 : index
    %c0_11 = arith.constant 0 : index
    %8 = vector.load %arg3[%c0_10, %c0_11] : memref<200x128xf32, #tpu.memory_space<vmem>>, vector<200x128xf32>
    %cst_12 = arith.constant dense<0.000000e+00> : vector<200x128xf32>
    %9 = tpu.matmul %8, %6, %cst_12 {dimension_numbers = #tpu.dot_dimension_numbers<[1], [0], [0], [1], [0, 0, 1, 1], [], []>} : vector<200x128xf32>, vector<128x128xf32>, vector<200x128xf32> -> vector<200x128xf32>
    %cst_13 = arith.constant 0.000000e+00 : f32
    %10 = vector.broadcast %cst_13 : f32 to vector<200x128xf32>
    %11 = arith.maximumf %9, %10 : vector<200x128xf32>
    %cst_14 = arith.constant dense<0.000000e+00> : vector<200x128xf32>
    %12 = tpu.matmul %11, %7, %cst_14 {dimension_numbers = #tpu.dot_dimension_numbers<[1], [0], [0], [1], [0, 0, 1, 1], [], []>} : vector<200x128xf32>, vector<128x128xf32>, vector<200x128xf32> -> vector<200x128xf32>
    %13 = vector.extract_strided_slice %12 {offsets = [0, 0], sizes = [200, 5], strides = [1, 1]} : vector<200x128xf32> to vector<200x5xf32>
    %c0_15 = arith.constant 0 : index
    %c0_16 = arith.constant 0 : index
    %14 = vector.load %arg2[%c0_15, %c0_16] : memref<200x5xf32, #tpu.memory_space<vmem>>, vector<200x5xf32>
    tpu.vector_store %arg2[%c0_15, %c0_16], %13 {strides = array<i32>} : memref<200x5xf32, #tpu.memory_space<vmem>>, vector<200x5xf32>,
    return
  }
}

</mosaic_0001>

<bundles_post_ra>
// kernel: _forward.1
= control target key start
LH: loop header
LB: loop body
LE: loop exit
PB: predicated region body
PF: predicated region fallthrough
CT: control target
= control target key end

     0   :  { %7 = vsyncpa [#allocation4], 0  ;;  %s995_s9 = smov [#allocation3]   ;;  %s1426_s0 = inlined_call_operand.vmem [shape: f32[200,10], index: 0, kind: input, shape index: {}]   ;;  %s1427_s1 = inlined_call_operand.hbm [shape: f32[256,128], index: 1, kind: input, shape index: {}]   ;;  %s1428_s2 = inlined_call_operand.vmem [shape: f32[200,5], index: 2, kind: output, shape index: {}]  }
   0x1   :  { %s15_s10 = sshll.u32 %s995_s9, 4  ;;  %s971_s13 = scalar_lea.hbm %s1427_s1, 4096  ;;  %s16_s10 = int_to_ptr.vmem [resolvable:$true] %s15_s10 }
   0x2   :  { %p972_p0 = scmp.ne.s32.totalorder %s1427_s1, %s971_s13  ;;  %p975_p1 = scmp.lt.u32.totalorder %s971_s13, %s1427_s1 }
   0x4   :  { %p977_p2 = pnand %p975_p1, %p972_p0 }
   0x6   :  { %980 = shalt.err (!%p977_p2)
}
   0x7   :  { %s981_s18 = scalar_lea.vmem %s16_s10, 4096  ;;  %p986_p4 = scmp.lt.s32.totalorder %s16_s10, %s16_s10 }
   0x8   :  { %p982_p3 = scmp.ne.s32.totalorder %s16_s10, %s981_s18  ;;  %p987_p5 = scmp.lt.s32.totalorder %s981_s18, %s981_s18 }
   0xa   :  { %p988_p6 = por %p987_p5, %p986_p4 }
   0xc   :  { %p989_p7 = pnand %p988_p6, %p982_p3 }
   0xe   :  { %992 = shalt.err (!%p989_p7)
}
   0xf   :  { %s996_s19 = smov 128   ;;  %s997_s20 = smov 8  }
  0x10   :  { %21 = dma.hbm_to_vmem [thread:$0]  %s1427_s1, 4096, %s16_s10, [#allocation4], %s996_s19, %s996_s19, %s997_s20  }
  0x11   :  { %993 = dma.done.wait [#allocation4], 4096  }
  0x12   :  { %994 = vsyncadd [#allocation4], 4294963200  ;;  %v998_v0 = vmov 0.0|0.0   ;;  %vm999_vm0 = vmmov 0   ;;  %v1000_v1 = vmov 0.0   ;;  %v127_v2 = vld [vmem:[#allocation3] sm:$0xff] }
  0x13   :  { %916 = vmatprep.subr.bf16.mxu0 %v998_v0  ;;  %734 = vmatprep.mubr.msk.f32.mxu0 %vm999_vm0, %v1000_v1  ;;  %25 = vst [vmem:[#allocation2] sm:$0xff] %v1000_v1  ;;  %26 = vst [vmem:[#allocation2 + $0x8] sm:$0xff] %v1000_v1  ;;  %v128_v3 = vld [vmem:[#allocation3 + $0x8] sm:$0xff]  ;;  %v129_v4 = vld [vmem:[#allocation3 + $0x10] sm:$0xff]  ;;  %vm75_vm1 = vcmask 80896   ;;  %vm101_vm2 = vcmask 89168  }
  0x14   :  { %27 = vst [vmem:[#allocation2 + $0x10] sm:$0xff] %v1000_v1  ;;  %28 = vst [vmem:[#allocation2 + $0x18] sm:$0xff] %v1000_v1  ;;  %940 = vmatprep.subr.bf16.mxu1 %v998_v0  ;;  %841 = vmatprep.mubr.msk.f32.mxu1 %vm999_vm0, %v1000_v1  ;;  %v917_v5 = vpack.c.bf16 %v128_v3, %v127_v2  ;;  %v130_v6 = vld [vmem:[#allocation3 + $0x18] sm:$0xff]  ;;  %v131_v8 = vld [vmem:[#allocation3 + $0x20] sm:$0xff]  ;;  %v1001_v18 = vmov 1.0   ;;  %vm589_vm3 = vcmask 39936  }
  0x15   :  { %29 = vst [vmem:[#allocation2 + $0x20] sm:$0xff] %v1000_v1  ;;  %30 = vst [vmem:[#allocation2 + $0x28] sm:$0xff] %v1000_v1  ;;  %v920_v7 = vpack.c.bf16 %v130_v6, %v129_v4  ;;  %v132_v9 = vld [vmem:[#allocation3 + $0x28] sm:$0xff]  ;;  %v50_v10 = vld [vmem:[%s1426_s0] sm:$0xff] }
  0x16   :  { %31 = vst [vmem:[#allocation2 + $0x30] sm:$0xff] %v1000_v1  ;;  %32 = vst [vmem:[#allocation2 + $0x38] sm:$0xff] %v1000_v1  ;;  %918 = vmatpush3.bf16.msra.mxu0 %v917_v5  ;;  %v51_v11 = vld [vmem:[%s1426_s0 + $0x8] sm:$0xff]  ;;  %v1067_v12 = vld [vmem:[#allocation3 + $0x30] sm:$0xff]  ;;  %v923_v17 = vpack.c.bf16 %v132_v9, %v131_v8 }
  0x17   :  { %33 = vst [vmem:[#allocation2 + $0x40] sm:$0xff] %v1000_v1  ;;  %34 = vst [vmem:[#allocation2 + $0x48] sm:$0xff] %v1000_v1  ;;  %919 = vmatprep.subr.bf16.mxu0 %v998_v0  ;;  %v1069_v13 = vld [vmem:[#allocation3 + $0x38] sm:$0xff]  ;;  %v52_v14 = vld [vmem:[%s1426_s0 + $0x10] sm:$0xff] }
  0x18   :  { %35 = vst [vmem:[#allocation2 + $0x50] sm:$0xff] %v1000_v1  ;;  %36 = vst [vmem:[#allocation2 + $0x58] sm:$0xff] %v1000_v1  ;;  %v53_v15 = vld [vmem:[%s1426_s0 + $0x18] sm:$0xff]  ;;  %v54_v16 = vld [vmem:[%s1426_s0 + $0x20] sm:$0xff]  ;;  %v926_v33 = vpack.c.bf16 %v1069_v13, %v1067_v12 }
  0x19   :  { %37 = vst [vmem:[#allocation2 + $0x60] sm:$0xff] %v1000_v1  ;;  %38 = vst [vmem:[#allocation2 + $0x68] sm:$0xff] %v1000_v1  ;;  %v55_v19 = vld [vmem:[%s1426_s0 + $0x28] sm:$0xff]  ;;  %v56_v20 = vld [vmem:[%s1426_s0 + $0x30] sm:$0xff] }
  0x1a   :  { %39 = vst [vmem:[#allocation2 + $0x70] sm:$0xff] %v1000_v1  ;;  %40 = vst [vmem:[#allocation2 + $0x78] sm:$0xff] %v1000_v1  ;;  %921 = vmatpush3.bf16.msra.mxu0 %v920_v7  ;;  %v57_v21 = vld [vmem:[%s1426_s0 + $0x38] sm:$0xff]  ;;  %v58_v22 = vld [vmem:[%s1426_s0 + $0x40] sm:$0xff] }
  0x1b   :  { %41 = vst [vmem:[#allocation2 + $0x80] sm:$0xff] %v1000_v1  ;;  %42 = vst [vmem:[#allocation2 + $0x88] sm:$0xff] %v1000_v1  ;;  %922 = vmatprep.subr.bf16.mxu0 %v998_v0  ;;  %v59_v23 = vld [vmem:[%s1426_s0 + $0x48] sm:$0xff]  ;;  %v60_v24 = vld [vmem:[%s1426_s0 + $0x50] sm:$0xff] }
  0x1c   :  { %43 = vst [vmem:[#allocation2 + $0x90] sm:$0xff] %v1000_v1  ;;  %44 = vst [vmem:[#allocation2 + $0x98] sm:$0xff] %v1000_v1  ;;  %v61_v25 = vld [vmem:[%s1426_s0 + $0x58] sm:$0xff]  ;;  %v62_v26 = vld [vmem:[%s1426_s0 + $0x60] sm:$0xff] }
  0x1d   :  { %45 = vst [vmem:[#allocation2 + $0xa0] sm:$0xff] %v1000_v1  ;;  %46 = vst [vmem:[#allocation2 + $0xa8] sm:$0xff] %v1000_v1  ;;  %v63_v27 = vld [vmem:[%s1426_s0 + $0x68] sm:$0xff]  ;;  %v136_v29 = vld [vmem:[#allocation3 + $0x48] sm:$0xff] }
  0x1e   :  { %47 = vst [vmem:[#allocation2 + $0xb0] sm:$0xff] %v1000_v1  ;;  %48 = vst [vmem:[#allocation2 + $0xb8] sm:$0xff] %v1000_v1  ;;  %v135_v28 = vld [vmem:[#allocation3 + $0x40] sm:$0xff]  ;;  %v64_v30 = vld [vmem:[%s1426_s0 + $0x70] sm:$0xff]  ;;  %924 = vmatpush3.bf16.msra.mxu0 %v923_v17 }
  0x1f   :  { %49 = vst [vmem:[#allocation2 + $0xc0] sm:$0xff] %v1000_v1  ;;  %76 = vst.msk [vmem:[#allocation2] sm:$0xff] %vm75_vm1, %v50_v10  ;;  %v65_v31 = vld [vmem:[%s1426_s0 + $0x78] sm:$0xff]  ;;  %v66_v32 = vld [vmem:[%s1426_s0 + $0x80] sm:$0xff]  ;;  %925 = vmatprep.subr.bf16.mxu0 %v998_v0  ;;  %v929_v44 = vpack.c.bf16 %v136_v29, %v135_v28 }
  0x20   :  { %77 = vst.msk [vmem:[#allocation2 + $0x8] sm:$0xff] %vm75_vm1, %v51_v11  ;;  %78 = vst.msk [vmem:[#allocation2 + $0x10] sm:$0xff] %vm75_vm1, %v52_v14  ;;  %v67_v34 = vld [vmem:[%s1426_s0 + $0x88] sm:$0xff]  ;;  %v68_v35 = vld [vmem:[%s1426_s0 + $0x90] sm:$0xff] }
  0x21   :  { %102 = vst.msk [vmem:[#allocation2] sm:$0xff] %vm101_vm2, %v1001_v18  ;;  %103 = vst.msk [vmem:[#allocation2 + $0x8] sm:$0xff] %vm101_vm2, %v1001_v18  ;;  %v69_v36 = vld [vmem:[%s1426_s0 + $0x98] sm:$0xff]  ;;  %v70_v37 = vld [vmem:[%s1426_s0 + $0xa0] sm:$0xff] }
  0x22   :  { %79 = vst.msk [vmem:[#allocation2 + $0x18] sm:$0xff] %vm75_vm1, %v53_v15  ;;  %80 = vst.msk [vmem:[#allocation2 + $0x20] sm:$0xff] %vm75_vm1, %v54_v16  ;;  %v71_v38 = vld [vmem:[%s1426_s0 + $0xa8] sm:$0xff]  ;;  %v72_v39 = vld [vmem:[%s1426_s0 + $0xb0] sm:$0xff]  ;;  %927 = vmatpush3.bf16.msra.mxu0 %v926_v33 }
  0x23   :  { %104 = vst.msk [vmem:[#allocation2 + $0x10] sm:$0xff] %vm101_vm2, %v1001_v18  ;;  %105 = vst.msk [vmem:[#allocation2 + $0x18] sm:$0xff] %vm101_vm2, %v1001_v18  ;;  %v73_v40 = vld [vmem:[%s1426_s0 + $0xb8] sm:$0xff]  ;;  %v74_v41 = vld [vmem:[%s1426_s0 + $0xc0] sm:$0xff]  ;;  %928 = vmatprep.subr.bf16.mxu0 %v998_v0 }
  0x24   :  { %106 = vst.msk [vmem:[#allocation2 + $0x20] sm:$0xff] %vm101_vm2, %v1001_v18  ;;  %v143_v42 = vld [vmem:[#allocation3 + $0x80] sm:$0xff]  ;;  %v144_v43 = vld [vmem:[#allocation3 + $0x88] sm:$0xff]  ;;  %v137_v46 = vld [vmem:[#allocation3 + $0x50] sm:$0xff] }
  0x25   :  { %81 = vst.msk [vmem:[#allocation2 + $0x28] sm:$0xff] %vm75_vm1, %v55_v19  ;;  %82 = vst.msk [vmem:[#allocation2 + $0x30] sm:$0xff] %vm75_vm1, %v56_v20  ;;  %v941_v45 = vpack.c.bf16 %v144_v43, %v143_v42  ;;  %v138_v47 = vld [vmem:[#allocation3 + $0x58] sm:$0xff]  ;;  %v139_v49 = vld [vmem:[#allocation3 + $0x60] sm:$0xff] }
  0x26   :  { %83 = vst.msk [vmem:[#allocation2 + $0x38] sm:$0xff] %vm75_vm1, %v57_v21  ;;  %84 = vst.msk [vmem:[#allocation2 + $0x40] sm:$0xff] %vm75_vm1, %v58_v22  ;;  %930 = vmatpush3.bf16.msra.mxu0 %v929_v44  ;;  %v932_v48 = vpack.c.bf16 %v138_v47, %v137_v46  ;;  %v140_v50 = vld [vmem:[#allocation3 + $0x68] sm:$0xff]  ;;  %v145_v51 = vld [vmem:[#allocation3 + $0x90] sm:$0xff] }
  0x27   :  { %107 = vst.msk [vmem:[#allocation2 + $0x28] sm:$0xff] %vm101_vm2, %v1001_v18  ;;  %108 = vst.msk [vmem:[#allocation2 + $0x30] sm:$0xff] %vm101_vm2, %v1001_v18  ;;  %942 = vmatpush3.bf16.msra.mxu1 %v941_v45  ;;  %931 = vmatprep.subr.bf16.mxu0 %v998_v0  ;;  %v935_v52 = vpack.c.bf16 %v140_v50, %v139_v49  ;;  %v146_v53 = vld [vmem:[#allocation3 + $0x98] sm:$0xff]  ;;  %v147_v54 = vld [vmem:[#allocation3 + $0xa0] sm:$0xff] }
  0x28   :  { %109 = vst.msk [vmem:[#allocation2 + $0x38] sm:$0xff] %vm101_vm2, %v1001_v18  ;;  %110 = vst.msk [vmem:[#allocation2 + $0x40] sm:$0xff] %vm101_vm2, %v1001_v18  ;;  %943 = vmatprep.subr.bf16.mxu1 %v998_v0  ;;  %v148_v55 = vld [vmem:[#allocation3 + $0xa8] sm:$0xff]  ;;  %v141_v56 = vld [vmem:[#allocation3 + $0x70] sm:$0xff]  ;;  %v944_v58 = vpack.c.bf16 %v146_v53, %v145_v51 }
  0x29   :  { %85 = vst.msk [vmem:[#allocation2 + $0x48] sm:$0xff] %vm75_vm1, %v59_v23  ;;  %86 = vst.msk [vmem:[#allocation2 + $0x50] sm:$0xff] %vm75_vm1, %v60_v24  ;;  %v142_v57 = vld [vmem:[#allocation3 + $0x78] sm:$0xff]  ;;  %v947_v59 = vpack.c.bf16 %v148_v55, %v147_v54  ;;  %v149_v61 = vld [vmem:[#allocation3 + $0xb0] sm:$0xff] }
  0x2a   :  { %111 = vst.msk [vmem:[#allocation2 + $0x48] sm:$0xff] %vm101_vm2, %v1001_v18  ;;  %112 = vst.msk [vmem:[#allocation2 + $0x50] sm:$0xff] %vm101_vm2, %v1001_v18  ;;  %933 = vmatpush3.bf16.msra.mxu0 %v932_v48  ;;  %v938_v60 = vpack.c.bf16 %v142_v57, %v141_v56  ;;  %v150_v62 = vld [vmem:[#allocation3 + $0xb8] sm:$0xff]  ;;  %v151_v3 = vld [vmem:[#allocation3 + $0xc0] sm:$0xff] }
  0x2b   :  { %87 = vst.msk [vmem:[#allocation2 + $0x58] sm:$0xff] %vm75_vm1, %v61_v25  ;;  %88 = vst.msk [vmem:[#allocation2 + $0x60] sm:$0xff] %vm75_vm1, %v62_v26  ;;  %934 = vmatprep.subr.bf16.mxu0 %v998_v0  ;;  %945 = vmatpush3.bf16.msra.mxu1 %v944_v58  ;;  %v950_v63 = vpack.c.bf16 %v150_v62, %v149_v61  ;;  %v159_v2 = vld [vmem:[#allocation2] sm:$0xff]  ;;  %v152_v4 = vld [vmem:[#allocation3 + $0xc8] sm:$0xff] }
  0x2c   :  { %89 = vst.msk [vmem:[#allocation2 + $0x68] sm:$0xff] %vm75_vm1, %v63_v27  ;;  %90 = vst.msk [vmem:[#allocation2 + $0x70] sm:$0xff] %vm75_vm1, %v64_v30  ;;  %946 = vmatprep.subr.bf16.mxu1 %v998_v0  ;;  %v953_v5 = vpack.c.bf16 %v152_v4, %v151_v3  ;;  %v160_v6 = vld [vmem:[#allocation2 + $0x8] sm:$0xff]  ;;  %v153_v7 = vld [vmem:[#allocation3 + $0xd0] sm:$0xff] }
  0x2d   :  { %113 = vst.msk [vmem:[#allocation2 + $0x58] sm:$0xff] %vm101_vm2, %v1001_v18  ;;  %114 = vst.msk [vmem:[#allocation2 + $0x60] sm:$0xff] %vm101_vm2, %v1001_v18  ;;  %v154_v8 = vld [vmem:[#allocation3 + $0xd8] sm:$0xff]  ;;  %v161_v10 = vld [vmem:[#allocation2 + $0x10] sm:$0xff] }
  0x2e   :  { %115 = vst.msk [vmem:[#allocation2 + $0x68] sm:$0xff] %vm101_vm2, %v1001_v18  ;;  %116 = vst.msk [vmem:[#allocation2 + $0x70] sm:$0xff] %vm101_vm2, %v1001_v18  ;;  %936 = vmatpush3.bf16.msra.mxu0 %v935_v52  ;;  %v956_v9 = vpack.c.bf16 %v154_v8, %v153_v7  ;;  %v155_v11 = vld [vmem:[#allocation3 + $0xe0] sm:$0xff]  ;;  %v156_v12 = vld [vmem:[#allocation3 + $0xe8] sm:$0xff] }
  0x2f   :  { %91 = vst.msk [vmem:[#allocation2 + $0x78] sm:$0xff] %vm75_vm1, %v65_v31  ;;  %92 = vst.msk [vmem:[#allocation2 + $0x80] sm:$0xff] %vm75_vm1, %v66_v32  ;;  %937 = vmatprep.subr.bf16.mxu0 %v998_v0  ;;  %948 = vmatpush3.bf16.msra.mxu1 %v947_v59  ;;  %v959_v13 = vpack.c.bf16 %v156_v12, %v155_v11  ;;  %v162_v14 = vld [vmem:[#allocation2 + $0x18] sm:$0xff]  ;;  %v163_v15 = vld [vmem:[#allocation2 + $0x20] sm:$0xff] }
  0x30   :  { %117 = vst.msk [vmem:[#allocation2 + $0x78] sm:$0xff] %vm101_vm2, %v1001_v18  ;;  %118 = vst.msk [vmem:[#allocation2 + $0x80] sm:$0xff] %vm101_vm2, %v1001_v18  ;;  %949 = vmatprep.subr.bf16.mxu1 %v998_v0  ;;  %v164_v16 = vld [vmem:[#allocation2 + $0x28] sm:$0xff]  ;;  %v165_v17 = vld [vmem:[#allocation2 + $0x30] sm:$0xff] }
  0x31   :  { %93 = vst.msk [vmem:[#allocation2 + $0x88] sm:$0xff] %vm75_vm1, %v67_v34  ;;  %94 = vst.msk [vmem:[#allocation2 + $0x90] sm:$0xff] %vm75_vm1, %v68_v35  ;;  %v168_v19 = vld [vmem:[#allocation2 + $0x48] sm:$0xff]  ;;  %v169_v20 = vld [vmem:[#allocation2 + $0x50] sm:$0xff] }
  0x32   :  { %95 = vst.msk [vmem:[#allocation2 + $0x98] sm:$0xff] %vm75_vm1, %v69_v36  ;;  %96 = vst.msk [vmem:[#allocation2 + $0xa0] sm:$0xff] %vm75_vm1, %v70_v37  ;;  %939 = vmatpush3.bf16.msra.mxu0 %v938_v60  ;;  %v157_v31 = vld [vmem:[#allocation3 + $0xf0] sm:$0xff]  ;;  %v158_v32 = vld [vmem:[#allocation3 + $0xf8] sm:$0xff] }
  0x33   :  { %119 = vst.msk [vmem:[#allocation2 + $0x88] sm:$0xff] %vm101_vm2, %v1001_v18  ;;  %120 = vst.msk [vmem:[#allocation2 + $0x90] sm:$0xff] %vm101_vm2, %v1001_v18  ;;  %951 = vmatpush3.bf16.msra.mxu1 %v950_v63  ;;  %v962_v34 = vpack.c.bf16 %v158_v32, %v157_v31 }
  0x34   :  { %121 = vst.msk [vmem:[#allocation2 + $0x98] sm:$0xff] %vm101_vm2, %v1001_v18  ;;  %122 = vst.msk [vmem:[#allocation2 + $0xa0] sm:$0xff] %vm101_vm2, %v1001_v18  ;;  %952 = vmatprep.subr.bf16.mxu1 %v998_v0  ;;  %v170_v21 = vld [vmem:[#allocation2 + $0x58] sm:$0xff]  ;;  %v171_v22 = vld [vmem:[#allocation2 + $0x60] sm:$0xff] }
  0x35   :  { %97 = vst.msk [vmem:[#allocation2 + $0xa8] sm:$0xff] %vm75_vm1, %v71_v38  ;;  %98 = vst.msk [vmem:[#allocation2 + $0xb0] sm:$0xff] %vm75_vm1, %v72_v39  ;;  %735 = vmatmul.mubr.f32.vlgmr.msra.gmra.mrb[0].mxu0 %v159_v2  ;;  %v172_v23 = vld [vmem:[#allocation2 + $0x68] sm:$0xff]  ;;  %v173_v24 = vld [vmem:[#allocation2 + $0x70] sm:$0xff] }
  0x36   :  { %123 = vst.msk [vmem:[#allocation2 + $0xa8] sm:$0xff] %vm101_vm2, %v1001_v18  ;;  %124 = vst.msk [vmem:[#allocation2 + $0xb0] sm:$0xff] %vm101_vm2, %v1001_v18  ;;  %737 = vmatprep.mubr.msk.f32.mxu0 %vm999_vm0, %v1000_v1 }
  0x37   :  { %99 = vst.msk [vmem:[#allocation2 + $0xb8] sm:$0xff] %vm75_vm1, %v73_v40  ;;  %100 = vst.msk [vmem:[#allocation2 + $0xc0] sm:$0xff] %vm75_vm1, %v74_v41  ;;  %954 = vmatpush3.bf16.msra.mxu1 %v953_v5  ;;  %v174_v25 = vld [vmem:[#allocation2 + $0x78] sm:$0xff]  ;;  %v175_v26 = vld [vmem:[#allocation2 + $0x80] sm:$0xff] }
  0x38   :  { %125 = vst.msk [vmem:[#allocation2 + $0xb8] sm:$0xff] %vm101_vm2, %v1001_v18  ;;  %126 = vst.msk [vmem:[#allocation2 + $0xc0] sm:$0xff] %vm101_vm2, %v1001_v18  ;;  %955 = vmatprep.subr.bf16.mxu1 %v998_v0  ;;  %v166_v18 = vld [vmem:[#allocation2 + $0x38] sm:$0xff] }
  0x39   :  { %738 = vmatmul.mubr.f32.gmra.mrb[2].mxu0 %v160_v6 }
  0x3a   :  { %740 = vmatprep.mubr.msk.f32.mxu0 %vm999_vm0, %v1000_v1  ;;  %v176_v27 = vld [vmem:[#allocation2 + $0x88] sm:$0xff]  ;;  %v177_v28 = vld [vmem:[#allocation2 + $0x90] sm:$0xff] }
  0x3b   :  { %957 = vmatpush3.bf16.msra.mxu1 %v956_v9  ;;  %v178_v29 = vld [vmem:[#allocation2 + $0x98] sm:$0xff]  ;;  %v179_v30 = vld [vmem:[#allocation2 + $0xa0] sm:$0xff] }
  0x3c   :  { %958 = vmatprep.subr.bf16.mxu1 %v998_v0 }
  0x3d   :  { %741 = vmatmul.mubr.f32.gmra.mrb[4].mxu0 %v161_v10  ;;  %v180_v33 = vld [vmem:[#allocation2 + $0xa8] sm:$0xff]  ;;  %v181_v35 = vld [vmem:[#allocation2 + $0xb0] sm:$0xff] }
  0x3e   :  { %743 = vmatprep.mubr.msk.f32.mxu0 %vm999_vm0, %v1000_v1 }
  0x3f   :  { %960 = vmatpush3.bf16.msra.mxu1 %v959_v13  ;;  %v182_v36 = vld [vmem:[#allocation2 + $0xb8] sm:$0xff]  ;;  %v183_v37 = vld [vmem:[#allocation2 + $0xc0] sm:$0xff] }
  0x40   :  { %961 = vmatprep.subr.bf16.mxu1 %v998_v0  ;;  %v167_v0 = vld [vmem:[#allocation2 + $0x40] sm:$0xff] }
  0x41   :  { %744 = vmatmul.mubr.f32.gmra.mrb[6].mxu0 %v162_v14 }
  0x42   :  { %746 = vmatprep.mubr.msk.f32.mxu0 %vm999_vm0, %v1000_v1 }
  0x43   :  { %963 = vmatpush3.bf16.msra.mxu1 %v962_v34 }
  0x45   :  { %747 = vmatmul.mubr.f32.gmra.mrb[8].mxu0 %v163_v15 }
  0x46   :  { %749 = vmatprep.mubr.msk.f32.mxu0 %vm999_vm0, %v1000_v1 }
  0x49   :  { %750 = vmatmul.mubr.f32.gmra.mrb[10].mxu0 %v164_v16 }
  0x4a   :  { %752 = vmatprep.mubr.msk.f32.mxu0 %vm999_vm0, %v1000_v1 }
  0x4d   :  { %753 = vmatmul.mubr.f32.gmra.mrb[12].mxu0 %v165_v17 }
  0x4e   :  { %755 = vmatprep.mubr.msk.f32.mxu0 %vm999_vm0, %v1000_v1 }
  0x51   :  { %756 = vmatmul.mubr.f32.gmra.mrb[14].mxu0 %v166_v18 }
  0x52   :  { %758 = vmatprep.mubr.msk.f32.mxu0 %vm999_vm0, %v1000_v1 }
  0x55   :  { %759 = vmatmul.mubr.f32.gmra.mrb[16].mxu0 %v167_v0 }
  0x56   :  { %761 = vmatprep.mubr.msk.f32.mxu0 %vm999_vm0, %v1000_v1 }
  0x59   :  { %762 = vmatmul.mubr.f32.gmra.mrb[18].mxu0 %v168_v19 }
  0x5a   :  { %764 = vmatprep.mubr.msk.f32.mxu0 %vm999_vm0, %v1000_v1 }
  0x5d   :  { %765 = vmatmul.mubr.f32.gmra.mrb[20].mxu0 %v169_v20 }
  0x5e   :  { %767 = vmatprep.mubr.msk.f32.mxu0 %vm999_vm0, %v1000_v1 }
  0x61   :  { %768 = vmatmul.mubr.f32.gmra.mrb[22].mxu0 %v170_v21 }
  0x62   :  { %770 = vmatprep.mubr.msk.f32.mxu0 %vm999_vm0, %v1000_v1 }
  0x65   :  { %771 = vmatmul.mubr.f32.gmra.mrb[24].mxu0 %v171_v22 }
  0x66   :  { %773 = vmatprep.mubr.msk.f32.mxu0 %vm999_vm0, %v1000_v1 }
  0x69   :  { %774 = vmatmul.mubr.f32.gmra.mrb[26].mxu0 %v172_v23 }
  0x6a   :  { %776 = vmatprep.mubr.msk.f32.mxu0 %vm999_vm0, %v1000_v1 }
  0x6d   :  { %777 = vmatmul.mubr.f32.gmra.mrb[28].mxu0 %v173_v24 }
  0x6e   :  { %779 = vmatprep.mubr.msk.f32.mxu0 %vm999_vm0, %v1000_v1 }
  0x71   :  { %780 = vmatmul.mubr.f32.gmra.mrb[30].mxu0 %v174_v25 }
  0x72   :  { %782 = vmatprep.mubr.msk.f32.mxu0 %vm999_vm0, %v1000_v1 }
  0x75   :  { %783 = vmatmul.mubr.f32.gmra.mrb[32].mxu0 %v175_v26 }
  0x76   :  { %785 = vmatprep.mubr.msk.f32.mxu0 %vm999_vm0, %v1000_v1 }
  0x79   :  { %786 = vmatmul.mubr.f32.gmra.mrb[34].mxu0 %v176_v27 }
  0x7a   :  { %788 = vmatprep.mubr.msk.f32.mxu0 %vm999_vm0, %v1000_v1 }
  0x7d   :  { %789 = vmatmul.mubr.f32.gmra.mrb[36].mxu0 %v177_v28 }
  0x7e   :  { %791 = vmatprep.mubr.msk.f32.mxu0 %vm999_vm0, %v1000_v1 }
  0x81   :  { %792 = vmatmul.mubr.f32.gmra.mrb[38].mxu0 %v178_v29 }
  0x82   :  { %794 = vmatprep.mubr.msk.f32.mxu0 %vm999_vm0, %v1000_v1 }
  0x85   :  { %795 = vmatmul.mubr.f32.gmra.mrb[40].mxu0 %v179_v30 }
  0x86   :  { %797 = vmatprep.mubr.msk.f32.mxu0 %vm999_vm0, %v1000_v1 }
  0x89   :  { %798 = vmatmul.mubr.f32.gmra.mrb[42].mxu0 %v180_v33 }
  0x8a   :  { %800 = vmatprep.mubr.msk.f32.mxu0 %vm999_vm0, %v1000_v1 }
  0x8d   :  { %801 = vmatmul.mubr.f32.gmra.mrb[44].mxu0 %v181_v35 }
  0x8e   :  { %803 = vmatprep.mubr.msk.f32.mxu0 %vm999_vm0, %v1000_v1 }
  0x91   :  { %804 = vmatmul.mubr.f32.gmra.mrb[46].mxu0 %v182_v36 }
  0x92   :  { %806 = vmatprep.mubr.msk.f32.mxu0 %vm999_vm0, %v1000_v1 }
  0x95   :  { %807 = vmatmul.mubr.f32.gmra.mrb[48].mxu0 %v183_v37 }
 0x108   :  { %v250_v38 = vpop.f32.mrb[0].mxu0 }
 0x109   :  { %v374_v39 = vmax.f32 %v250_v38, 0.0  ;;  %v736_v40 = vpop.f32.mrb[1].mxu0 }
 0x10b   :  { %842 = vmatmul.mubr.f32.vlgmr.msra.gmra.mrb[0].mxu1 %v374_v39 }
 0x10c   :  { %v255_v41 = vpop.f32.mrb[2].mxu0  ;;  %844 = vmatprep.mubr.msk.f32.mxu1 %vm999_vm0, %v1000_v1 }
 0x10d   :  { %v375_v42 = vmax.f32 %v255_v41, 0.0  ;;  %v739_v43 = vpop.f32.mrb[3].mxu0 }
 0x10f   :  { %845 = vmatmul.mubr.f32.gmra.mrb[2].mxu1 %v375_v42 }
 0x110   :  { %v260_v44 = vpop.f32.mrb[4].mxu0  ;;  %847 = vmatprep.mubr.msk.f32.mxu1 %vm999_vm0, %v1000_v1 }
 0x111   :  { %v376_v45 = vmax.f32 %v260_v44, 0.0  ;;  %v742_v46 = vpop.f32.mrb[5].mxu0 }
 0x113   :  { %848 = vmatmul.mubr.f32.gmra.mrb[4].mxu1 %v376_v45 }
 0x114   :  { %v265_v47 = vpop.f32.mrb[6].mxu0  ;;  %850 = vmatprep.mubr.msk.f32.mxu1 %vm999_vm0, %v1000_v1 }
 0x115   :  { %v377_v48 = vmax.f32 %v265_v47, 0.0  ;;  %v745_v49 = vpop.f32.mrb[7].mxu0 }
 0x117   :  { %851 = vmatmul.mubr.f32.gmra.mrb[6].mxu1 %v377_v48 }
 0x118   :  { %v270_v50 = vpop.f32.mrb[8].mxu0  ;;  %853 = vmatprep.mubr.msk.f32.mxu1 %vm999_vm0, %v1000_v1 }
 0x119   :  { %v378_v51 = vmax.f32 %v270_v50, 0.0  ;;  %v748_v52 = vpop.f32.mrb[9].mxu0 }
 0x11b   :  { %854 = vmatmul.mubr.f32.gmra.mrb[8].mxu1 %v378_v51 }
 0x11c   :  { %v275_v53 = vpop.f32.mrb[10].mxu0  ;;  %856 = vmatprep.mubr.msk.f32.mxu1 %vm999_vm0, %v1000_v1 }
 0x11d   :  { %v379_v54 = vmax.f32 %v275_v53, 0.0  ;;  %v751_v55 = vpop.f32.mrb[11].mxu0 }
 0x11f   :  { %857 = vmatmul.mubr.f32.gmra.mrb[10].mxu1 %v379_v54 }
 0x120   :  { %v280_v56 = vpop.f32.mrb[12].mxu0  ;;  %859 = vmatprep.mubr.msk.f32.mxu1 %vm999_vm0, %v1000_v1 }
 0x121   :  { %v380_v57 = vmax.f32 %v280_v56, 0.0  ;;  %v754_v58 = vpop.f32.mrb[13].mxu0 }
 0x123   :  { %860 = vmatmul.mubr.f32.gmra.mrb[12].mxu1 %v380_v57 }
 0x124   :  { %v285_v59 = vpop.f32.mrb[14].mxu0  ;;  %862 = vmatprep.mubr.msk.f32.mxu1 %vm999_vm0, %v1000_v1 }
 0x125   :  { %v381_v60 = vmax.f32 %v285_v59, 0.0  ;;  %v757_v61 = vpop.f32.mrb[15].mxu0 }
 0x127   :  { %863 = vmatmul.mubr.f32.gmra.mrb[14].mxu1 %v381_v60 }
 0x128   :  { %v290_v62 = vpop.f32.mrb[16].mxu0  ;;  %865 = vmatprep.mubr.msk.f32.mxu1 %vm999_vm0, %v1000_v1 }
 0x129   :  { %v382_v63 = vmax.f32 %v290_v62, 0.0  ;;  %v760_v2 = vpop.f32.mrb[17].mxu0 }
 0x12b   :  { %866 = vmatmul.mubr.f32.gmra.mrb[16].mxu1 %v382_v63 }
 0x12c   :  { %v295_v3 = vpop.f32.mrb[18].mxu0  ;;  %868 = vmatprep.mubr.msk.f32.mxu1 %vm999_vm0, %v1000_v1 }
 0x12d   :  { %v383_v4 = vmax.f32 %v295_v3, 0.0  ;;  %v763_v5 = vpop.f32.mrb[19].mxu0 }
 0x12f   :  { %869 = vmatmul.mubr.f32.gmra.mrb[18].mxu1 %v383_v4 }
 0x130   :  { %v300_v6 = vpop.f32.mrb[20].mxu0  ;;  %871 = vmatprep.mubr.msk.f32.mxu1 %vm999_vm0, %v1000_v1 }
 0x131   :  { %v384_v7 = vmax.f32 %v300_v6, 0.0  ;;  %v766_v8 = vpop.f32.mrb[21].mxu0 }
 0x133   :  { %872 = vmatmul.mubr.f32.gmra.mrb[20].mxu1 %v384_v7 }
 0x134   :  { %v305_v9 = vpop.f32.mrb[22].mxu0  ;;  %874 = vmatprep.mubr.msk.f32.mxu1 %vm999_vm0, %v1000_v1 }
 0x135   :  { %v385_v10 = vmax.f32 %v305_v9, 0.0  ;;  %v769_v11 = vpop.f32.mrb[23].mxu0 }
 0x137   :  { %875 = vmatmul.mubr.f32.gmra.mrb[22].mxu1 %v385_v10 }
 0x138   :  { %v310_v12 = vpop.f32.mrb[24].mxu0  ;;  %877 = vmatprep.mubr.msk.f32.mxu1 %vm999_vm0, %v1000_v1 }
 0x139   :  { %v386_v13 = vmax.f32 %v310_v12, 0.0  ;;  %v772_v14 = vpop.f32.mrb[25].mxu0 }
 0x13b   :  { %878 = vmatmul.mubr.f32.gmra.mrb[24].mxu1 %v386_v13 }
 0x13c   :  { %v315_v15 = vpop.f32.mrb[26].mxu0  ;;  %880 = vmatprep.mubr.msk.f32.mxu1 %vm999_vm0, %v1000_v1 }
 0x13d   :  { %v387_v16 = vmax.f32 %v315_v15, 0.0  ;;  %v775_v17 = vpop.f32.mrb[27].mxu0 }
 0x13f   :  { %881 = vmatmul.mubr.f32.gmra.mrb[26].mxu1 %v387_v16 }
 0x140   :  { %v320_v18 = vpop.f32.mrb[28].mxu0  ;;  %883 = vmatprep.mubr.msk.f32.mxu1 %vm999_vm0, %v1000_v1 }
 0x141   :  { %v388_v0 = vmax.f32 %v320_v18, 0.0  ;;  %v778_v19 = vpop.f32.mrb[29].mxu0 }
 0x143   :  { %884 = vmatmul.mubr.f32.gmra.mrb[28].mxu1 %v388_v0 }
 0x144   :  { %v325_v20 = vpop.f32.mrb[30].mxu0  ;;  %886 = vmatprep.mubr.msk.f32.mxu1 %vm999_vm0, %v1000_v1 }
 0x145   :  { %v389_v21 = vmax.f32 %v325_v20, 0.0  ;;  %v781_v22 = vpop.f32.mrb[31].mxu0 }
 0x147   :  { %887 = vmatmul.mubr.f32.gmra.mrb[30].mxu1 %v389_v21 }
 0x148   :  { %v330_v23 = vpop.f32.mrb[32].mxu0  ;;  %889 = vmatprep.mubr.msk.f32.mxu1 %vm999_vm0, %v1000_v1 }
 0x149   :  { %v390_v24 = vmax.f32 %v330_v23, 0.0  ;;  %v784_v25 = vpop.f32.mrb[33].mxu0 }
 0x14b   :  { %890 = vmatmul.mubr.f32.gmra.mrb[32].mxu1 %v390_v24 }
 0x14c   :  { %v335_v26 = vpop.f32.mrb[34].mxu0  ;;  %892 = vmatprep.mubr.msk.f32.mxu1 %vm999_vm0, %v1000_v1 }
 0x14d   :  { %v391_v27 = vmax.f32 %v335_v26, 0.0  ;;  %v787_v28 = vpop.f32.mrb[35].mxu0 }
 0x14f   :  { %893 = vmatmul.mubr.f32.gmra.mrb[34].mxu1 %v391_v27 }
 0x150   :  { %v340_v29 = vpop.f32.mrb[36].mxu0  ;;  %895 = vmatprep.mubr.msk.f32.mxu1 %vm999_vm0, %v1000_v1 }
 0x151   :  { %v392_v30 = vmax.f32 %v340_v29, 0.0  ;;  %v790_v31 = vpop.f32.mrb[37].mxu0 }
 0x153   :  { %896 = vmatmul.mubr.f32.gmra.mrb[36].mxu1 %v392_v30 }
 0x154   :  { %v345_v32 = vpop.f32.mrb[38].mxu0  ;;  %898 = vmatprep.mubr.msk.f32.mxu1 %vm999_vm0, %v1000_v1 }
 0x155   :  { %v393_v33 = vmax.f32 %v345_v32, 0.0  ;;  %v793_v34 = vpop.f32.mrb[39].mxu0 }
 0x157   :  { %899 = vmatmul.mubr.f32.gmra.mrb[38].mxu1 %v393_v33 }
 0x158   :  { %v350_v35 = vpop.f32.mrb[40].mxu0  ;;  %901 = vmatprep.mubr.msk.f32.mxu1 %vm999_vm0, %v1000_v1 }
 0x159   :  { %v394_v36 = vmax.f32 %v350_v35, 0.0  ;;  %v796_v37 = vpop.f32.mrb[41].mxu0 }
 0x15b   :  { %902 = vmatmul.mubr.f32.gmra.mrb[40].mxu1 %v394_v36 }
 0x15c   :  { %v355_v38 = vpop.f32.mrb[42].mxu0  ;;  %904 = vmatprep.mubr.msk.f32.mxu1 %vm999_vm0, %v1000_v1 }
 0x15d   :  { %v395_v39 = vmax.f32 %v355_v38, 0.0  ;;  %v799_v40 = vpop.f32.mrb[43].mxu0 }
 0x15f   :  { %905 = vmatmul.mubr.f32.gmra.mrb[42].mxu1 %v395_v39 }
 0x160   :  { %v360_v41 = vpop.f32.mrb[44].mxu0  ;;  %907 = vmatprep.mubr.msk.f32.mxu1 %vm999_vm0, %v1000_v1 }
 0x161   :  { %v396_v42 = vmax.f32 %v360_v41, 0.0  ;;  %v802_v43 = vpop.f32.mrb[45].mxu0 }
 0x163   :  { %908 = vmatmul.mubr.f32.gmra.mrb[44].mxu1 %v396_v42 }
 0x164   :  { %v365_v44 = vpop.f32.mrb[46].mxu0  ;;  %910 = vmatprep.mubr.msk.f32.mxu1 %vm999_vm0, %v1000_v1 }
 0x165   :  { %v397_v45 = vmax.f32 %v365_v44, 0.0  ;;  %v805_v46 = vpop.f32.mrb[47].mxu0 }
 0x167   :  { %911 = vmatmul.mubr.f32.gmra.mrb[46].mxu1 %v397_v45 }
 0x168   :  { %v370_v47 = vpop.f32.mrb[48].mxu0  ;;  %913 = vmatprep.mubr.msk.f32.mxu1 %vm999_vm0, %v1000_v1 }
 0x169   :  { %v398_v48 = vmax.f32 %v370_v47, 0.0  ;;  %v808_v49 = vpop.f32.mrb[49].mxu0 }
 0x16b   :  { %914 = vmatmul.mubr.f32.gmra.mrb[48].mxu1 %v398_v48 }
 0x1de   :  { %v465_v50 = vpop.f32.mrb[0].mxu1 }
 0x1df   :  { %590 = vst.msk [vmem:[%s1428_s2] sm:$0xff] %vm589_vm3, %v465_v50  ;;  %v843_v51 = vpop.f32.mrb[1].mxu1 }
 0x1e2   :  { %v470_v52 = vpop.f32.mrb[2].mxu1 }
 0x1e3   :  { %591 = vst.msk [vmem:[%s1428_s2 + $0x8] sm:$0xff] %vm589_vm3, %v470_v52  ;;  %v846_v53 = vpop.f32.mrb[3].mxu1 }
 0x1e6   :  { %v475_v54 = vpop.f32.mrb[4].mxu1 }
 0x1e7   :  { %592 = vst.msk [vmem:[%s1428_s2 + $0x10] sm:$0xff] %vm589_vm3, %v475_v54  ;;  %v849_v1 = vpop.f32.mrb[5].mxu1 }
 0x1ea   :  { %v480_v55 = vpop.f32.mrb[6].mxu1 }
 0x1eb   :  { %593 = vst.msk [vmem:[%s1428_s2 + $0x18] sm:$0xff] %vm589_vm3, %v480_v55  ;;  %v852_v56 = vpop.f32.mrb[7].mxu1 }
 0x1ee   :  { %v485_v57 = vpop.f32.mrb[8].mxu1 }
 0x1ef   :  { %594 = vst.msk [vmem:[%s1428_s2 + $0x20] sm:$0xff] %vm589_vm3, %v485_v57  ;;  %v855_v58 = vpop.f32.mrb[9].mxu1 }
 0x1f2   :  { %v490_v59 = vpop.f32.mrb[10].mxu1 }
 0x1f3   :  { %595 = vst.msk [vmem:[%s1428_s2 + $0x28] sm:$0xff] %vm589_vm3, %v490_v59  ;;  %v858_v60 = vpop.f32.mrb[11].mxu1 }
 0x1f6   :  { %v495_v61 = vpop.f32.mrb[12].mxu1 }
 0x1f7   :  { %596 = vst.msk [vmem:[%s1428_s2 + $0x30] sm:$0xff] %vm589_vm3, %v495_v61  ;;  %v861_v62 = vpop.f32.mrb[13].mxu1 }
 0x1fa   :  { %v500_v63 = vpop.f32.mrb[14].mxu1 }
 0x1fb   :  { %597 = vst.msk [vmem:[%s1428_s2 + $0x38] sm:$0xff] %vm589_vm3, %v500_v63  ;;  %v864_v2 = vpop.f32.mrb[15].mxu1 }
 0x1fe   :  { %v505_v3 = vpop.f32.mrb[16].mxu1 }
 0x1ff   :  { %598 = vst.msk [vmem:[%s1428_s2 + $0x40] sm:$0xff] %vm589_vm3, %v505_v3  ;;  %v867_v4 = vpop.f32.mrb[17].mxu1 }
 0x202   :  { %v510_v5 = vpop.f32.mrb[18].mxu1 }
 0x203   :  { %599 = vst.msk [vmem:[%s1428_s2 + $0x48] sm:$0xff] %vm589_vm3, %v510_v5  ;;  %v870_v6 = vpop.f32.mrb[19].mxu1 }
 0x206   :  { %v515_v7 = vpop.f32.mrb[20].mxu1 }
 0x207   :  { %600 = vst.msk [vmem:[%s1428_s2 + $0x50] sm:$0xff] %vm589_vm3, %v515_v7  ;;  %v873_v8 = vpop.f32.mrb[21].mxu1 }
 0x20a   :  { %v520_v9 = vpop.f32.mrb[22].mxu1 }
 0x20b   :  { %601 = vst.msk [vmem:[%s1428_s2 + $0x58] sm:$0xff] %vm589_vm3, %v520_v9  ;;  %v876_v10 = vpop.f32.mrb[23].mxu1 }
 0x20e   :  { %v525_v11 = vpop.f32.mrb[24].mxu1 }
 0x20f   :  { %602 = vst.msk [vmem:[%s1428_s2 + $0x60] sm:$0xff] %vm589_vm3, %v525_v11  ;;  %v879_v12 = vpop.f32.mrb[25].mxu1 }
 0x212   :  { %v530_v13 = vpop.f32.mrb[26].mxu1 }
 0x213   :  { %603 = vst.msk [vmem:[%s1428_s2 + $0x68] sm:$0xff] %vm589_vm3, %v530_v13  ;;  %v882_v14 = vpop.f32.mrb[27].mxu1 }
 0x216   :  { %v535_v15 = vpop.f32.mrb[28].mxu1 }
 0x217   :  { %604 = vst.msk [vmem:[%s1428_s2 + $0x70] sm:$0xff] %vm589_vm3, %v535_v15  ;;  %v885_v16 = vpop.f32.mrb[29].mxu1 }
 0x21a   :  { %v540_v17 = vpop.f32.mrb[30].mxu1 }
 0x21b   :  { %605 = vst.msk [vmem:[%s1428_s2 + $0x78] sm:$0xff] %vm589_vm3, %v540_v17  ;;  %v888_v18 = vpop.f32.mrb[31].mxu1 }
 0x21e   :  { %v545_v0 = vpop.f32.mrb[32].mxu1 }
 0x21f   :  { %606 = vst.msk [vmem:[%s1428_s2 + $0x80] sm:$0xff] %vm589_vm3, %v545_v0  ;;  %v891_v19 = vpop.f32.mrb[33].mxu1 }
 0x222   :  { %v550_v20 = vpop.f32.mrb[34].mxu1 }
 0x223   :  { %607 = vst.msk [vmem:[%s1428_s2 + $0x88] sm:$0xff] %vm589_vm3, %v550_v20  ;;  %v894_v21 = vpop.f32.mrb[35].mxu1 }
 0x226   :  { %v555_v22 = vpop.f32.mrb[36].mxu1 }
 0x227   :  { %608 = vst.msk [vmem:[%s1428_s2 + $0x90] sm:$0xff] %vm589_vm3, %v555_v22  ;;  %v897_v23 = vpop.f32.mrb[37].mxu1 }
 0x22a   :  { %v560_v24 = vpop.f32.mrb[38].mxu1 }
 0x22b   :  { %609 = vst.msk [vmem:[%s1428_s2 + $0x98] sm:$0xff] %vm589_vm3, %v560_v24  ;;  %v900_v25 = vpop.f32.mrb[39].mxu1 }
 0x22e   :  { %v565_v26 = vpop.f32.mrb[40].mxu1 }
 0x22f   :  { %610 = vst.msk [vmem:[%s1428_s2 + $0xa0] sm:$0xff] %vm589_vm3, %v565_v26  ;;  %v903_v27 = vpop.f32.mrb[41].mxu1 }
 0x232   :  { %v570_v28 = vpop.f32.mrb[42].mxu1 }
 0x233   :  { %611 = vst.msk [vmem:[%s1428_s2 + $0xa8] sm:$0xff] %vm589_vm3, %v570_v28  ;;  %v906_v29 = vpop.f32.mrb[43].mxu1 }
 0x236   :  { %v575_v30 = vpop.f32.mrb[44].mxu1 }
 0x237   :  { %612 = vst.msk [vmem:[%s1428_s2 + $0xb0] sm:$0xff] %vm589_vm3, %v575_v30  ;;  %v909_v31 = vpop.f32.mrb[45].mxu1 }
 0x23a   :  { %v580_v32 = vpop.f32.mrb[46].mxu1 }
 0x23b   :  { %613 = vst.msk [vmem:[%s1428_s2 + $0xb8] sm:$0xff] %vm589_vm3, %v580_v32  ;;  %v912_v33 = vpop.f32.mrb[47].mxu1 }
 0x23e   :  { %v585_v34 = vpop.f32.mrb[48].mxu1 }
 0x23f   :  { %614 = vst.msk [vmem:[%s1428_s2 + $0xc0] sm:$0xff] %vm589_vm3, %v585_v34  ;;  %v915_v35 = vpop.f32.mrb[49].mxu1 }
 0x240   :  { %619 = vsyncpa [#allocation4], 1 }

</bundles_post_ra>
